<compile_context>
chip_gen: v5e
topology: v5e:2x2
jax: 0.10.0
libtpu: 0.0.40
codegen_flags: <defaults>
</compile_context>

<pallas_src>
import functools

import numpy as np
import jax
import jax.numpy as jnp
from jax.experimental import pallas as pl
from jax.experimental.pallas import tpu as pltpu


def _injector_kernel(wid_ref, iid_ref, w_row_ref, inj_row_ref, out_ref):
    """One grid step == one token.

    wid_ref / iid_ref : SMEM scalar-prefetch arrays [B*S] int32
                        (token id, injection row index or -1).
    w_row_ref   : (1,1,H) embedding-table row for this token, gathered from
                  HBM by the data-dependent BlockSpec index_map
                  (== self.wrapped(input_ids) for this token).
    inj_row_ref : (1,1,H) textual-inversion replacement row (row 0 when the
                  token is not injected; unused in that case).
    """
    t = pl.program_id(0)
    inj = iid_ref[t]

    @pl.when(inj < 0)
    def _():
        out_ref[...] = w_row_ref[...]          # keep the embedding lookup

    @pl.when(inj >= 0)
    def _():
        out_ref[...] = inj_row_ref[...]        # injected textual-inversion row


@functools.partial(jax.jit)
def safe_embedding_injector(input_ids, weight, inj_idx, inj_vecs):
    """Pallas wrapper.

    input_ids : [B, S] int32   token ids
    weight    : [V, H]         wrapped embedding table (stays in HBM)
    inj_idx   : [B, S] int32   per-token injection row (-1 == no injection)
    inj_vecs  : [N, H]         flat table of injected embedding rows
    returns   : [B, S, H]      inputs_embeds after injection
    """
    B, S = input_ids.shape
    V, H = weight.shape
    N = inj_vecs.shape[0]
    T = B * S

    # Scalar-prefetch operands (SMEM): used only for addressing / the select.
    wid = jnp.clip(input_ids.reshape(T), 0, V - 1).astype(jnp.int32)
    iid = inj_idx.reshape(T).astype(jnp.int32)

    # Tables as [rows, 1, H] so each gathered block's trailing dims equal the
    # full array dims (TPU-friendly (sublane, lane) block shape).
    weight3 = weight.reshape(V, 1, H)
    inj3 = inj_vecs.astype(weight.dtype).reshape(N, 1, H)   # .to(dtype=embeds.dtype)

    grid_spec = pltpu.PrefetchScalarGridSpec(
        num_scalar_prefetch=2,
        grid=(T,),
        in_specs=[
            # embedding-table row gather: HBM -> (1,1,H) VMEM block per token
            pl.BlockSpec((1, 1, H), lambda t, wid, iid: (wid[t], 0, 0)),
            # injection-table row gather (clamped to row 0 when not injected)
            pl.BlockSpec((1, 1, H),
                         lambda t, wid, iid: (jnp.maximum(iid[t], 0), 0, 0)),
        ],
        out_specs=pl.BlockSpec((1, 1, H), lambda t, wid, iid: (t, 0, 0)),
    )

    out = pl.pallas_call(
        _injector_kernel,
        out_shape=jax.ShapeDtypeStruct((T, 1, H), weight.dtype),
        grid_spec=grid_spec,
        compiler_params=pltpu.CompilerParams(
            dimension_semantics=("parallel",)),   # megacore split on v7x
    )(wid, iid, weight3, inj3)

    return out.reshape(B, S, H)


def build_injection_tables(batch_fixes, B, S, H, dtype=np.float32):
    """Host-side glue: mirror _inject_embedding / _validate_embedding logic by
    compiling the python fix list into (per-token index map, flat row table)."""
    idx = np.full((B, S), -1, dtype=np.int32)
    rows = []
    for b, fixes in enumerate(batch_fixes):
        for offset, emb in fixes:
            emb = np.asarray(emb, dtype=dtype)
            available = S - offset - 1
            if available <= 0:
                continue                                     # skip, keep tensor
            if emb.shape[0] > available:                     # truncation warning path
                emb = emb[:available]
            emb_len = min(available, emb.shape[0])
            for j in range(emb_len):
                idx[b, offset + 1 + j] = len(rows)
                rows.append(emb[j])
    if not rows:                                             # "no fixes" fast path
        rows = [np.zeros((H,), dtype=dtype)]
    table = np.stack(rows, axis=0).astype(dtype)
    # pad row count to a multiple of 8 for friendlier sublane layout
    pad = (-table.shape[0]) % 8
    if pad:
        table = np.concatenate([table, np.zeros((pad, H), dtype=dtype)], axis=0)
    return idx, table


if __name__ == "__main__":
    # Small shapes; H kept a multiple of 128 so output stores are lane-dense.
    B, S, H, V = 2, 8, 128, 64

    key = jax.random.PRNGKey(0)
    k_w, k_ids, k_e0, k_e1 = jax.random.split(key, 4)

    # deterministic synthetic parameters (wrapped.weight) and inputs
    weight = jax.random.normal(k_w, (V, H), dtype=jnp.float32)
    input_ids = jax.random.randint(k_ids, (B, S), 0, V, dtype=jnp.int32)

    # textual-inversion embeddings (embedding.vec), [n_vec, H]
    emb0 = np.asarray(jax.random.normal(k_e0, (3, H), dtype=jnp.float32))   # fits
    emb1 = np.asarray(jax.random.normal(k_e1, (10, H), dtype=jnp.float32))  # truncated
    batch_fixes = [
        [(2, emb0)],   # batch 0: inject 3 rows starting at token 3
        [(1, emb1)],   # batch 1: inject (truncated to 6) rows starting at token 2
    ]

    inj_idx_np, inj_vecs_np = build_injection_tables(batch_fixes, B, S, H)
    inj_idx = jnp.asarray(inj_idx_np)
    inj_vecs = jnp.asarray(inj_vecs_np)

    out = safe_embedding_injector(input_ids, weight, inj_idx, inj_vecs)
    out = jax.block_until_ready(out)

    # pure-numpy reference of the forward pass
    ref = np.asarray(weight)[np.asarray(input_ids)]              # embedding lookup
    for b in range(B):
        for s in range(S):
            if inj_idx_np[b, s] >= 0:
                ref[b, s, :] = inj_vecs_np[inj_idx_np[b, s]]     # injected rows

    np.testing.assert_allclose(np.asarray(out), ref, atol=1e-6, rtol=1e-6)
    print("KERNEL_OK")
</pallas_src>

<mosaic_0001>
module attributes {stable_mosaic.version = 11 : i64} {
  func.func @_injector_kernel(%arg0: i32, %arg1: memref<16xi32, #tpu.memory_space<smem>>, %arg2: memref<16xi32, #tpu.memory_space<smem>>, %arg3: memref<1x1x128xf32, #tpu.memory_space<vmem>>, %arg4: memref<1x1x128xf32, #tpu.memory_space<vmem>>, %arg5: memref<1x1x128xf32, #tpu.memory_space<vmem>>) attributes {dimension_semantics = [#tpu.dimension_semantics<parallel>], iteration_bounds = array<i64: 16>, scalar_prefetch = 2 : i64, scratch_operands = 0 : i64, tpu.core_type = #tpu.core_type<tc>, window_params = [{transform_indices = @transform_0, window_bounds = array<i64: 1, 1, 128>}, {transform_indices = @transform_1, window_bounds = array<i64: 1, 1, 128>}, {transform_indices = @transform_2, window_bounds = array<i64: 1, 1, 128>}]} {
    %0 = arith.index_cast %arg0 : i32 to index
    %1 = memref.load %arg2[%0] : memref<16xi32, #tpu.memory_space<smem>>
    %c0_i32 = arith.constant 0 : i32
    %2 = arith.cmpi slt, %1, %c0_i32 : i32
    %3 = arith.extui %2 : i1 to i32
    %c0_i32_0 = arith.constant 0 : i32
    %4 = arith.cmpi ne, %3, %c0_i32_0 : i32
    scf.if %4 {
      %c0 = arith.constant 0 : index
      %c0_3 = arith.constant 0 : index
      %c0_4 = arith.constant 0 : index
      %8 = vector.load %arg3[%c0, %c0_3, %c0_4] : memref<1x1x128xf32, #tpu.memory_space<vmem>>, vector<1x1x128xf32>
      %c0_5 = arith.constant 0 : index
      %c0_6 = arith.constant 0 : index
      %c0_7 = arith.constant 0 : index
      %9 = vector.load %arg5[%c0_5, %c0_6, %c0_7] : memref<1x1x128xf32, #tpu.memory_space<vmem>>, vector<1x1x128xf32>
      tpu.vector_store %arg5[%c0_5, %c0_6, %c0_7], %8 {strides = array<i32>} : memref<1x1x128xf32, #tpu.memory_space<vmem>>, vector<1x1x128xf32>,
    } else {
    }
    %c0_i32_1 = arith.constant 0 : i32
    %5 = arith.cmpi sge, %1, %c0_i32_1 : i32
    %6 = arith.extui %5 : i1 to i32
    %c0_i32_2 = arith.constant 0 : i32
    %7 = arith.cmpi ne, %6, %c0_i32_2 : i32
    scf.if %7 {
      %c0 = arith.constant 0 : index
      %c0_3 = arith.constant 0 : index
      %c0_4 = arith.constant 0 : index
      %8 = vector.load %arg4[%c0, %c0_3, %c0_4] : memref<1x1x128xf32, #tpu.memory_space<vmem>>, vector<1x1x128xf32>
      %c0_5 = arith.constant 0 : index
      %c0_6 = arith.constant 0 : index
      %c0_7 = arith.constant 0 : index
      %9 = vector.load %arg5[%c0_5, %c0_6, %c0_7] : memref<1x1x128xf32, #tpu.memory_space<vmem>>, vector<1x1x128xf32>
      tpu.vector_store %arg5[%c0_5, %c0_6, %c0_7], %8 {strides = array<i32>} : memref<1x1x128xf32, #tpu.memory_space<vmem>>, vector<1x1x128xf32>,
    } else {
    }
    return
  }
  func.func @transform_0(%arg0: i32, %arg1: memref<16xi32, #tpu.memory_space<smem>>, %arg2: memref<16xi32, #tpu.memory_space<smem>>) -> (i32, i32, i32) {
    %0 = arith.index_cast %arg0 : i32 to index
    %1 = memref.load %arg1[%0] : memref<16xi32, #tpu.memory_space<smem>>
    %c0_i32 = arith.constant 0 : i32
    %c0_i32_0 = arith.constant 0 : i32
    %c0_i32_1 = arith.constant 0 : i32
    return %1, %c0_i32, %c0_i32_0 : i32, i32, i32
  }
  func.func @transform_1(%arg0: i32, %arg1: memref<16xi32, #tpu.memory_space<smem>>, %arg2: memref<16xi32, #tpu.memory_space<smem>>) -> (i32, i32, i32) {
    %0 = arith.index_cast %arg0 : i32 to index
    %1 = memref.load %arg2[%0] : memref<16xi32, #tpu.memory_space<smem>>
    %c0_i32 = arith.constant 0 : i32
    %2 = arith.maxsi %1, %c0_i32 : i32
    %c0_i32_0 = arith.constant 0 : i32
    %c0_i32_1 = arith.constant 0 : i32
    %c0_i32_2 = arith.constant 0 : i32
    return %2, %c0_i32_0, %c0_i32_1 : i32, i32, i32
  }
  func.func @transform_2(%arg0: i32, %arg1: memref<16xi32, #tpu.memory_space<smem>>, %arg2: memref<16xi32, #tpu.memory_space<smem>>) -> (i32, i32, i32) {
    %c0_i32 = arith.constant 0 : i32
    %c0_i32_0 = arith.constant 0 : i32
    %c0_i32_1 = arith.constant 0 : i32
    return %arg0, %c0_i32, %c0_i32_0 : i32, i32, i32
  }
}

</mosaic_0001>

<bundles_post_ra>
// kernel: safe_embedding_injector.1
= control target key start
LH: loop header
LB: loop body
LE: loop exit
PB: predicated region body
PF: predicated region fallthrough
CT: control target
= control target key end

     0   :  { %s652_s21 = smov [#allocation3]   ;;  %s653_s22 = smov [#allocation4]   ;;  %s936_s0 = inlined_call_operand.vmem [shape: s32[16], index: 0, kind: input, shape index: {}]   ;;  %s937_s2 = inlined_call_operand.hbm [shape: f32[64,1,128], index: 2, kind: input, shape index: {}]   ;;  %s938_s3 = inlined_call_operand.hbm [shape: f32[16,1,128], index: 3, kind: input, shape index: {}]   ;;  %s939_s4 = inlined_call_operand.hbm [shape: f32[16,1,128], index: 4, kind: output, shape index: {}]   ;;  %s940_s1 = inlined_call_operand.vmem [shape: s32[16], index: 1, kind: input, shape index: {}]  }
   0x1   :  { %s10_s17 = sshll.u32 %s936_s0, 4  ;;  %s15_s20 = sshll.u32 %s940_s1, 4  ;;  %s11_s17 = int_to_ptr.vmem [resolvable:$true] %s10_s17  ;;  %s16_s20 = int_to_ptr.vmem [resolvable:$true] %s15_s20 }
   0x2   :  { %13 = dma.vmem_to_smem %s11_s17, 16, %s652_s21, [#allocation2] }
   0x3   :  { %18 = dma.vmem_to_smem %s16_s20, 16, %s653_s22, [#allocation2] }
   0x4   :  { %598 = dma.done.wait [#allocation2], 32 }
   0x5   :  { %599 = vsyncadd [#allocation2], 4294967264 }
   0x6   :  { %21 = sfence }
   0x7   :  { %22 = vsyncpa [#allocation6], 0 }
   0x8   :  { %24 = vsyncpa [#allocation6 + $0x1], 0 }
   0x9   :  { %25 = vsyncpa [#allocation9], 0 }
   0xa   :  { %27 = vsyncpa [#allocation9 + $0x1], 0 }
   0xb   :  { %28 = vsyncpa [#allocation7], 0 }
   0xc   :  { %30 = vsyncpa [#allocation7 + $0x1], 0  ;;  %s685_s0 = smov 0   ;;  %s687_s23 = smov 0  }
   0xd   :  { %s689_s1 = smov 0   ;;  %s691_s24 = smov 0  }
   0xe   :  { %s693_s25 = smov 0   ;;  %s695_s26 = smov 0  }
   0xf   :  { %s697_s27 = smov 0   ;;  %s699_s28 = smov 0  }
  0x10   :  { %s701_s29 = smov 0   ;;  %s703_s30 = smov 0  }
  0x11 LB: > { %947 = sst [smem:[#allocation19_spill]] %s614_s0  ;;  %s734_s5 = sadd.s32 4294967295, %s650_s30   ;;  %s650_s30 = sphi %s703_s30, %s979_s30   ;;  %s646_s29 = sphi %s701_s29, %s971_s29   ;;  %s642_s28 = sphi %s699_s28, %s978_s28   ;;  %s638_s27 = sphi %s697_s27, %s977_s27   ;;  %s634_s26 = sphi %s695_s26, %s976_s26   ;;  %s630_s25 = sphi %s693_s25, %s975_s25   ;;  %s626_s24 = sphi %s691_s24, %s974_s24   ;;  %s622_s1 = sphi %s689_s1, %s969_s1   ;;  %s618_s23 = sphi %s687_s23, %s973_s23   ;;  %s614_s0 = sphi %s685_s0, %s972_s0  }
  0x12   : > { %948 = sst [smem:[#allocation20_spill]] %s622_s1  ;;  %s329_s6 = sadd.s32 4294967294, %s650_s30  }
  0x13   : > { %949 = sst [smem:[#allocation21_spill]] %s646_s29  ;;  %s738_s7 = sadd.s32 1, %s650_s30  }
  0x14   : > { %s40_s8 = sld [smem:[#allocation3 + %s650_s30]]  ;;  %s45_s10 = sadd.s32 1, %s646_s29 }
  0x15   : > { %s41_s9 = sld [smem:[#allocation3 + %s738_s7]]  ;;  %p52_p0 = scmp.ne.s32.totalorder %s646_s29, %s642_s28 }
  0x16   : > { %p53_p1 = scmp.eq.s32.totalorder %s650_s30, 0  ;;  %p58_p2 = scmp.ne.s32.totalorder %s642_s28, %s638_s27 }
  0x17   : > { %p946_p3 = scmp.eq.s32.totalorder %s734_s5, 0  ;;  %s100_s12 = ssub.s32 %s650_s30, %s738_s7 }
  0x18   : > { %p750_p4 = por %p53_p1, %p52_p0  ;;  %p101_p6 = scmp.eq.s32.totalorder %s100_s12, 0 }
  0x19   : > { %p758_p5 = por %p946_p3, %p58_p2  ;;  %s103_s14 = sadd.s32 1, %s622_s1 }
  0x1a   : > { %p113_p7 = scmp.ne.s32.totalorder %s622_s1, %s618_s23  ;;  %p114_p8 = scmp.eq.s32.totalorder %s734_s5, 15 }
  0x1b   : > { %s42_s15 = ssub.s32 %s40_s8, %s41_s9  ;;  %p119_p10 = scmp.ne.s32.totalorder %s618_s23, %s614_s0 }
  0x1c   : > { %p43_p9 = scmp.eq.s32.totalorder %s42_s15, 0  ;;  %p774_p11 = por %p114_p8, %p113_p7 }
  0x1d   : > { %s769_s16 = scalar_select %p101_p6, %s622_s1, %s103_s14  }
  0x1e   : > { %s772_s17 = scalar_select %p43_p9, %s646_s29, %s45_s10  }
  0x1f   : > { %952 = sst [smem:[#allocation22_spill]] %s769_s16  ;;  %p120_p12 = scmp.eq.s32.totalorder %s329_s6, 15 }
  0x20   : > { %953 = sst [smem:[#allocation23_spill]] %s772_s17  ;;  %p945_p13 = scmp.lt.s32.totalorder %s650_s30, 16 }
  0x21   : > { %p779_p0 = por %p120_p12, %p119_p10  ;;  %s140_s20 = sand.u32 1, %s646_s29  }
  0x22   : > { %s337_s21 = scalar_select %p750_p4, [#allocation3], [#allocation11] }
  0x23   : > { %s955_s19 = scalar_select %p779_p0, 1, 0 }
  0x24   : > { %s338_s22 = scalar_select %p750_p4, %s650_s30, 0 }
  0x25   : > { %956 = sst [smem:[#allocation24_spill]] %s955_s19  ;;  %s981_s21 = smov (!%p945_p13, %s337_s21), [#allocation13] }
  0x26   : > { %s983_s22 = smov (!%p945_p13, %s338_s22), 0  ;;  %s143_s27 = scalar_lea.vmem [#allocation5], %s140_s20 }
  0x27   : > { %s151_s8 = sshll.u32 %s143_s27, 4  ;;  %p797_p2 = pnand %p945_p13, %p750_p4  ;;  %s152_s8 = int_to_ptr.vmem [resolvable:$true] %s151_s8 }
  0x28   : > { %s144_s9 = sld [smem:[%s981_s21 + %s983_s22]]  ;;  %p332_p6 = scmp.ge.s32.totalorder %s650_s30, 1 }
  0x29   : > { %p176_p7 = scmp.lt.s32.totalorder %s650_s30, 17  ;;  %s68_s27 = sld [smem:[#allocation4 + %s650_s30]] }
  0x2a   : > { %s71_s17 = sld [smem:[#allocation4 + %s738_s7]]  ;;  %s141_s29 = scalar_lea.sflag [#allocation6], %s140_s20 }
  0x2b   : > { %p803_p8 = pnand %p332_p6, %p176_p7  ;;  %p474_p9 = pneg %p797_p2 }
  0x2c   : > { %s477_s19 = scalar_lea.hbm %s937_s2, 64 }
  0x2e   : > { %s147_s15 = scalar_lea.hbm %s937_s2, %s144_s9 }
  0x2f   : > { %s149_s11 = sshll.u32 %s147_s15, 4  ;;  %s150_s11 = int_to_ptr.hbm [resolvable:$true] %s149_s11 }
  0x30   : > { %s470_s16 = sshra.s32 %s150_s11, 4  ;;  %s471_s16 = int_to_ptr.hbm [resolvable:$true] %s470_s16 }
  0x31   : > { %s472_s1 = scalar_lea.hbm %s471_s16, 1  ;;  %p478_p6 = scmp.lt.s32.totalorder %s471_s16, %s937_s2 }
  0x32   : > { %p473_p4 = scmp.ne.s32.totalorder %s471_s16, %s472_s1  ;;  %p479_p7 = scmp.lt.s32.totalorder %s477_s19, %s472_s1 }
  0x34   : > { %p475_p10 = pnand %p474_p9, %p473_p4  ;;  %p480_p13 = por %p479_p7, %p478_p6 }
  0x36   : > { %p476_p12 = pneg %p475_p10 }
  0x38   : > { %p481_p3 = pnand %p480_p13, %p476_p12 }
  0x3a   : > { %484 = shalt.err (!%p481_p3)
}
  0x3b   : > { %352 = dma.hbm_to_vmem [thread:$0]  (!%p797_p2), %s150_s11, 16, %s152_s8, %s141_s29  }
  0x3c   : > { %p84_p4 = scmp.ne.s32.totalorder %s634_s26, %s630_s25  ;;  %p90_p9 = scmp.ne.s32.totalorder %s630_s25, %s626_s24 }
  0x3d   : > { %p69_p10 = scmp.gt.s32.totalorder %s68_s27, 0  ;;  %p72_p13 = scmp.gt.s32.totalorder %s71_s17, 0 }
  0x3e   : > { %p828_p3 = por %p84_p4, %p53_p1  ;;  %p960_p12 = scmp.eq.s32.totalorder %s734_s5, 0 }
  0x3f   : > { %s985_s27 = smov (!%p69_p10, %s68_s27), 0  ;;  %s987_s17 = smov (!%p72_p13, %s71_s17), 0 }
  0x40   : > { %p834_p6 = por %p90_p9, %p960_p12  ;;  %s74_s29 = ssub.s32 %s985_s27, %s987_s17 }
  0x41   : > { %s77_s24 = sadd.s32 1, %s634_s26  ;;  %p75_p2 = scmp.eq.s32.totalorder %s74_s29, 0 }
  0x42   : > { %s340_s16 = scalar_select %p828_p3, [#allocation4], [#allocation12] }
  0x43   : > { %s842_s19 = scalar_select %p75_p2, %s634_s26, %s77_s24  }
  0x44   : > { %s341_s20 = scalar_select %p828_p3, %s650_s30, 0 }
  0x45   : > { %p962_p1 = scmp.lt.s32.totalorder %s650_s30, 16  ;;  %s158_s6 = sand.u32 1, %s634_s26  }
  0x46   : > { %s161_s9 = scalar_lea.vmem [#allocation8], %s158_s6  ;;  %s159_s22 = scalar_lea.sflag [#allocation9], %s158_s6 }
  0x47   : > { %s989_s16 = smov (!%p962_p1, %s340_s16), [#allocation14]  ;;  %p963_p7 = pmov %p962_p1 }
  0x48   : > { %p964_p4 = pmov %p962_p1  ;;  %s171_s14 = sshll.u32 %s161_s9, 4  ;;  %s172_s14 = int_to_ptr.vmem [resolvable:$true] %s171_s14 }
  0x49   : > { %s991_s20 = smov (!%p963_p7, %s341_s20), 0 }
  0x4a   : > { %p855_p9 = pnand %p964_p4, %p828_p3  ;;  %s162_s17 = sld [smem:[%s989_s16 + %s991_s20]] }
  0x4b   : > { %s507_s16 = scalar_lea.hbm %s938_s3, 16 }
  0x4c   : > { %p504_p13 = pneg %p855_p9 }
  0x50   : > { %p163_p10 = scmp.gt.s32.totalorder %s162_s17, 0 }
  0x52   : > { %s993_s17 = smov (!%p163_p10, %s162_s17), 0 }
  0x53   : > { %s167_s11 = scalar_lea.hbm %s938_s3, %s993_s17 }
  0x54   : > { %s169_s21 = sshll.u32 %s167_s11, 4  ;;  %s170_s21 = int_to_ptr.hbm [resolvable:$true] %s169_s21 }
  0x55   : > { %s500_s12 = sshra.s32 %s170_s21, 4  ;;  %s501_s12 = int_to_ptr.hbm [resolvable:$true] %s500_s12 }
  0x56   : > { %s502_s0 = scalar_lea.hbm %s501_s12, 1  ;;  %p508_p1 = scmp.lt.s32.totalorder %s501_s12, %s938_s3 }
  0x57   : > { %p503_p3 = scmp.ne.s32.totalorder %s501_s12, %s502_s0  ;;  %p509_p7 = scmp.lt.s32.totalorder %s507_s16, %s502_s0 }
  0x59   : > { %p505_p12 = pnand %p504_p13, %p503_p3  ;;  %p510_p4 = por %p509_p7, %p508_p1 }
  0x5b   : > { %p506_p2 = pneg %p505_p12 }
  0x5d   : > { %p511_p10 = pnand %p510_p4, %p506_p2 }
  0x5f   : > { %514 = shalt.err (!%p511_p10)
}
  0x60   : > { %357 = dma.hbm_to_vmem [thread:$0]  (!%p855_p9), %s170_s21, 16, %s172_s14, %s159_s22  }
  0x61   : > { %180 = sbr.rel (%p803_p8) target bundleno = 144 (0x90), region = 28  ;;  %s182_s17 = sand.u32 (!%p803_p8), 1, %s642_s28  }
  0x62   : > { %s183_s6 = scalar_lea.sflag (!%p803_p8), [#allocation6], %s182_s17  ;;  %s185_s15 = scalar_lea.vmem (!%p803_p8), [#allocation5], %s182_s17 }
  0x66   : > { %601 = dma.done.wait (%p758_p5), %s183_s6, 16  }
  0x67   : > { %603 = vsyncadd (%p758_p5), %s183_s6, 4294967280  ;;  %s191_s27 = sand.u32 1, %s630_s25  }
  0x68   : > { %s192_s11 = scalar_lea.sflag [#allocation9], %s191_s27  ;;  %s194_s12 = scalar_lea.vmem [#allocation8], %s191_s27 }
  0x69   : > { %605 = dma.done.wait (%p834_p6), %s192_s11, 16  }
  0x6a   : > { %607 = vsyncadd (%p834_p6), %s192_s11, 4294967280  ;;  %s216_s10 = sand.u32 1, %s618_s23   ;;  %s222_s8 = sld [smem:[#allocation4 + %s734_s5]] }
  0x6b   : > { %s217_s14 = scalar_lea.vmem [#allocation10], %s216_s10 }
  0x70   : > { %p333_p8 = scmp.ge.s32.totalorder %s222_s8, 0 }
  0x72   : > { %226 = sbr.rel (%p333_p8) target bundleno = 121 (0x79), region = 40 }
  0x77   : > { %v227_v0 = vld [vmem:[%s185_s15] sm:$0x1] }
  0x78   : > { %228 = vst [vmem:[%s217_s14] sm:$0x1] %v227_v0 }
  0x79 PF: > { %p334_p5 = scmp.lt.s32.totalorder %s222_s8, 0 }
  0x7b   : > { %232 = sbr.rel (%p334_p5) target bundleno = 130 (0x82), region = 44 }
  0x80   : > { %v233_v1 = vld [vmem:[%s194_s12] sm:$0x1] }
  0x81   : > { %234 = vst [vmem:[%s217_s14] sm:$0x1] %v233_v1 }
  0x82 PF: > { %s244_s1 = scalar_lea.hbm %s939_s4, %s734_s5  ;;  %s246_s22 = sshll.u32 %s217_s14, 4  ;;  %s247_s22 = int_to_ptr.vmem [resolvable:$true] %s246_s22 }
  0x83   : > { %s248_s0 = sshll.u32 %s244_s1, 4  ;;  %s236_s29 = scalar_lea.sflag [#allocation7], %s216_s10  ;;  %s249_s0 = int_to_ptr.hbm [resolvable:$true] %s248_s0 }
  0x84   : > { %s544_s24 = sshra.s32 %s249_s0, 4  ;;  %s550_s17 = scalar_lea.hbm %s939_s4, 16  ;;  %s545_s24 = int_to_ptr.hbm [resolvable:$true] %s544_s24 }
  0x85   : > { %s546_s16 = scalar_lea.hbm %s545_s24, 1  ;;  %p551_p13 = scmp.lt.s32.totalorder %s545_s24, %s939_s4 }
  0x86   : > { %p547_p6 = scmp.ne.s32.totalorder %s545_s24, %s546_s16  ;;  %p552_p12 = scmp.lt.s32.totalorder %s550_s17, %s546_s16 }
  0x88   : > { %p548_p9 = pnand %p547_p6, %p774_p11  ;;  %p553_p2 = por %p552_p12, %p551_p13 }
  0x8a   : > { %p549_p3 = pneg %p548_p9 }
  0x8c   : > { %p554_p1 = pnand %p553_p2, %p549_p3 }
  0x8e   : > { %557 = shalt.err (!%p554_p1)
}
  0x8f   : > { %345 = dma.vmem_to_hbm [thread:$0]  (%p774_p11), %s247_s22, 16, %s249_s0, %s236_s29  }
  0x90 PF: > { %s966_s5 = sld [smem:[#allocation19_spill]]  ;;  %p363_p7 = scmp.ge.s32.totalorder %s650_s30, 2 }
  0x92   : > { %p359_p4 = pnand %p363_p7, %p779_p0 }
  0x94   : > { %p360_p10 = pneg %p359_p4 }
  0x96   : > { %s260_s11 = sand.u32 1, %s966_s5  }
  0x97   : > { %s261_s12 = scalar_lea.sflag [#allocation7], %s260_s11 }
  0x98   : > { %609 = dma.done.wait (%p360_p10), %s261_s12, 16  }
  0x99   : > { %611 = vsyncadd (%p360_p10), %s261_s12, 4294967280  ;;  %s968_s10 = sld [smem:[#allocation20_spill]]  ;;  %p33_p11 = scmp.ge.s32.totalorder %s738_s7, 18  }
  0x9a   : > { %s969_s1 = sld [smem:[#allocation22_spill]]  ;;  %s972_s0 = smov %s618_s23 }
  0x9b   : > { %s970_s18 = sld [smem:[#allocation21_spill]]  ;;  %s974_s24 = smov %s630_s25 }
  0x9c   : > { %s971_s29 = sld [smem:[#allocation23_spill]]  ;;  %s975_s25 = smov %s634_s26 }
  0x9d   : > { %s976_s26 = smov %s842_s19  ;;  %s977_s27 = smov %s642_s28 }
  0x9e   : > { %s979_s30 = smov %s738_s7  ;;  %35 = sbr.rel (!%p33_p11) target bundleno = 17 (0x11), region = 94 }
  0x9f   : > { %s973_s23 = smov %s968_s10 }
  0xa1   : > { %s978_s28 = smov %s970_s18 }
  0xa3   :  { %266 = vsyncpa [#allocation6], 1 }
  0xa4   :  { %268 = vsyncpa [#allocation6 + $0x1], 1 }
  0xa5   :  { %269 = vsyncpa [#allocation9], 1 }
  0xa6   :  { %271 = vsyncpa [#allocation9 + $0x1], 1 }
  0xa7   :  { %272 = vsyncpa [#allocation7], 1 }
  0xa8   :  { %274 = vsyncpa [#allocation7 + $0x1], 1 }

</bundles_post_ra>
